<compile_context>
chip_gen: v5e
topology: v5e:2x2
jax: 0.10.0
libtpu: 0.0.40
codegen_flags: <defaults>
</compile_context>

<pallas_src>
import functools

import jax
import jax.numpy as jnp
from jax.experimental import pallas as pl
from jax.experimental.pallas import tpu as pltpu  # noqa: F401  (TPU backend)


# ----------------------------------------------------------------------------
# Fused Pallas kernel: GCN layer 1 -> GCN layer 2 -> pair gather -> cosine
# ----------------------------------------------------------------------------
def fused_link_kernel(adj_ref, x_ref, w1_ref, b1_ref, w2_ref, b2_ref,
                      idx_ref, o_ref, *, p_pad):
    adj = adj_ref[...]                                   # (N, N) f32

    # ---- GCN layer 1: h = relu(adj @ x @ W1 + b1) -------------------------
    agg1 = jnp.dot(adj, x_ref[...], preferred_element_type=jnp.float32)
    h = jnp.dot(agg1, w1_ref[...],
                preferred_element_type=jnp.float32) + b1_ref[...]
    h = jnp.maximum(h, 0.0)

    # ---- GCN layer 2: h = adj @ h @ W2 + b2 --------------------------------
    agg2 = jnp.dot(adj, h, preferred_element_type=jnp.float32)
    h = jnp.dot(agg2, w2_ref[...],
                preferred_element_type=jnp.float32) + b2_ref[...]          # (N, D)

    # ---- pair gather: ONE one-hot matmul, pair axis lands on lanes ---------
    # idx_ref is (1, 2*P_pad): [node1 | pad | node2 | pad], lane-dense.
    n = adj_ref.shape[0]
    iota = jax.lax.broadcasted_iota(jnp.int32, (n, 2 * p_pad), 0)          # (N, 2P)
    sel_t = (iota == idx_ref[...]).astype(jnp.float32)                     # one-hot cols
    # pairs_t[d, j] = sum_k h[k, d] * sel_t[k, j]   (transposed-LHS matmul)
    pairs_t = jax.lax.dot_general(h, sel_t, (((0,), (0,)), ((), ())),
                                  preferred_element_type=jnp.float32)      # (D, 2P)
    x1t = pairs_t[:, :p_pad]                                               # (D, P_pad)
    x2t = pairs_t[:, p_pad:]                                               # (D, P_pad)

    # ---- cosine head: dot * rsqrt(max(s1*s2, eps^2)), lane-dense result ----
    dotp = jnp.sum(x1t * x2t, axis=0, keepdims=True)                       # (1, P_pad)
    s1 = jnp.sum(x1t * x1t, axis=0, keepdims=True)
    s2 = jnp.sum(x2t * x2t, axis=0, keepdims=True)
    inv = jax.lax.rsqrt(jnp.maximum(s1 * s2, 1e-12))   # eps=1e-6 -> eps^2=1e-12
    o_ref[...] = (dotp * inv).astype(o_ref.dtype)


# ----------------------------------------------------------------------------
# Wrapper (single pallas_call, full-size VMEM blocks, no grid)
# ----------------------------------------------------------------------------
def _full_spec(shape):
    # single full-size block, no grid
    return pl.BlockSpec(shape, lambda: tuple(0 for _ in shape))


def link_finetune_forward(params, x, adj, node1, node2):
    """Fused Pallas implementation of LinkFinetune.forward (f32)."""
    n = adj.shape[0]
    d_in = x.shape[1]
    hid = params["w1"].shape[1]
    d_out = params["w2"].shape[1]
    p = node1.shape[0]
    p_pad = max(128, ((p + 127) // 128) * 128)          # lane-dense pair slab

    # pack node1 / node2 into one lane-dense int32 row (pad indices -> node 0;
    # padded lanes produce junk cosines that the wrapper slices away)
    idx = jnp.zeros((1, 2 * p_pad), dtype=jnp.int32)
    idx = idx.at[0, :p].set(node1.astype(jnp.int32))
    idx = idx.at[0, p_pad:p_pad + p].set(node2.astype(jnp.int32))

    flops = 2 * (n * n * d_in + n * d_in * hid + n * n * hid
                 + n * hid * d_out + n * (2 * p_pad) * d_out) + 10 * p_pad
    bytes_accessed = 4 * (n * n + n * d_in + d_in * hid + hid
                          + hid * d_out + d_out + 2 * p_pad + p_pad)

    kernel = functools.partial(fused_link_kernel, p_pad=p_pad)
    out_row = pl.pallas_call(
        kernel,
        out_shape=jax.ShapeDtypeStruct((1, p_pad), jnp.float32),
        in_specs=[
            _full_spec(adj.shape),
            _full_spec(x.shape),
            _full_spec(params["w1"].shape),
            _full_spec(params["b1"].shape),
            _full_spec(params["w2"].shape),
            _full_spec(params["b2"].shape),
            _full_spec((1, 2 * p_pad)),
        ],
        out_specs=_full_spec((1, p_pad)),
        cost_estimate=pl.CostEstimate(flops=flops,
                                      transcendentals=p_pad,
                                      bytes_accessed=bytes_accessed),
    )(adj, x, params["w1"], params["b1"], params["w2"], params["b2"], idx)

    # layout plumbing only: lane-dense row -> (P, 1) column expected by callers
    return out_row[0, :p].reshape(p, 1)


# ----------------------------------------------------------------------------
# Main
# ----------------------------------------------------------------------------
if __name__ == "__main__":
    key = jax.random.PRNGKey(0)
    k_x, k_adj, k_w1, k_w2, k_n1, k_n2 = jax.random.split(key, 6)

    N, D_IN, HIDDEN, D_OUT, P = 16, 8, 32, 32, 8

    x = jax.random.normal(k_x, (N, D_IN), dtype=jnp.float32)

    # symmetric row-normalized adjacency with self-loops (deterministic)
    a = (jax.random.uniform(k_adj, (N, N)) > 0.7).astype(jnp.float32)
    a = jnp.maximum(a, a.T) + jnp.eye(N, dtype=jnp.float32)
    adj = a / jnp.sum(a, axis=1, keepdims=True)

    params = {
        "w1": jax.random.normal(k_w1, (D_IN, HIDDEN), dtype=jnp.float32) * 0.1,
        "b1": jnp.zeros((1, HIDDEN), dtype=jnp.float32),
        "w2": jax.random.normal(k_w2, (HIDDEN, D_OUT), dtype=jnp.float32) * 0.1,
        "b2": jnp.zeros((1, D_OUT), dtype=jnp.float32),
    }

    node1 = jax.random.randint(k_n1, (P,), 0, N, dtype=jnp.int32)
    node2 = jax.random.randint(k_n2, (P,), 0, N, dtype=jnp.int32)

    fwd = jax.jit(link_finetune_forward)
    out = jax.block_until_ready(fwd(params, x, adj, node1, node2))

    # plain-JAX reference (PyTorch semantics: gather from GNN output h)
    h_ref = jnp.maximum(adj @ x @ params["w1"] + params["b1"], 0.0)
    h_ref = adj @ h_ref @ params["w2"] + params["b2"]
    x1r, x2r = h_ref[node1], h_ref[node2]
    cos_ref = (jnp.sum(x1r * x2r, axis=1) /
               jnp.maximum(jnp.linalg.norm(x1r, axis=1) * jnp.linalg.norm(x2r, axis=1),
                           1e-6))[:, None]
    assert out.shape == (P, 1)
    assert jnp.allclose(out, cos_ref, atol=1e-5), "mismatch vs reference"

    print("KERNEL_OK")
</pallas_src>

<mosaic_0001>
module attributes {stable_mosaic.version = 11 : i64} {
  func.func @fused_link_kernel(%arg0: memref<16x16xf32, #tpu.memory_space<vmem>>, %arg1: memref<16x8xf32, #tpu.memory_space<vmem>>, %arg2: memref<8x32xf32, #tpu.memory_space<vmem>>, %arg3: memref<1x32xf32, #tpu.memory_space<vmem>>, %arg4: memref<32x32xf32, #tpu.memory_space<vmem>>, %arg5: memref<1x32xf32, #tpu.memory_space<vmem>>, %arg6: memref<1x256xi32, #tpu.memory_space<vmem>>, %arg7: memref<1x128xf32, #tpu.memory_space<vmem>>) attributes {dimension_semantics = [], scalar_prefetch = 0 : i64, scratch_operands = 0 : i64, tpu.core_type = #tpu.core_type<tc>} {
    %c0 = arith.constant 0 : index
    %c0_0 = arith.constant 0 : index
    %0 = vector.load %arg0[%c0, %c0_0] : memref<16x16xf32, #tpu.memory_space<vmem>>, vector<16x16xf32>
    %c0_1 = arith.constant 0 : index
    %c0_2 = arith.constant 0 : index
    %1 = vector.load %arg1[%c0_1, %c0_2] : memref<16x8xf32, #tpu.memory_space<vmem>>, vector<16x8xf32>
    %cst = arith.constant dense<0.000000e+00> : vector<16x8xf32>
    %2 = tpu.matmul %0, %1, %cst {dimension_numbers = #tpu.dot_dimension_numbers<[1], [0], [0], [1], [0, 0, 1, 1], [], []>} : vector<16x16xf32>, vector<16x8xf32>, vector<16x8xf32> -> vector<16x8xf32>
    %c0_3 = arith.constant 0 : index
    %c0_4 = arith.constant 0 : index
    %3 = vector.load %arg2[%c0_3, %c0_4] : memref<8x32xf32, #tpu.memory_space<vmem>>, vector<8x32xf32>
    %cst_5 = arith.constant dense<0.000000e+00> : vector<16x32xf32>
    %4 = tpu.matmul %2, %3, %cst_5 {dimension_numbers = #tpu.dot_dimension_numbers<[1], [0], [0], [1], [0, 0, 1, 1], [], []>} : vector<16x8xf32>, vector<8x32xf32>, vector<16x32xf32> -> vector<16x32xf32>
    %c0_6 = arith.constant 0 : index
    %c0_7 = arith.constant 0 : index
    %5 = vector.load %arg3[%c0_6, %c0_7] : memref<1x32xf32, #tpu.memory_space<vmem>>, vector<1x32xf32>
    %6 = vector.broadcast %5 : vector<1x32xf32> to vector<16x32xf32>
    %7 = arith.addf %4, %6 : vector<16x32xf32>
    %cst_8 = arith.constant 0.000000e+00 : f32
    %8 = vector.broadcast %cst_8 : f32 to vector<16x32xf32>
    %9 = arith.maximumf %7, %8 : vector<16x32xf32>
    %cst_9 = arith.constant dense<0.000000e+00> : vector<16x32xf32>
    %10 = tpu.matmul %0, %9, %cst_9 {dimension_numbers = #tpu.dot_dimension_numbers<[1], [0], [0], [1], [0, 0, 1, 1], [], []>} : vector<16x16xf32>, vector<16x32xf32>, vector<16x32xf32> -> vector<16x32xf32>
    %c0_10 = arith.constant 0 : index
    %c0_11 = arith.constant 0 : index
    %11 = vector.load %arg4[%c0_10, %c0_11] : memref<32x32xf32, #tpu.memory_space<vmem>>, vector<32x32xf32>
    %cst_12 = arith.constant dense<0.000000e+00> : vector<16x32xf32>
    %12 = tpu.matmul %10, %11, %cst_12 {dimension_numbers = #tpu.dot_dimension_numbers<[1], [0], [0], [1], [0, 0, 1, 1], [], []>} : vector<16x32xf32>, vector<32x32xf32>, vector<16x32xf32> -> vector<16x32xf32>
    %c0_13 = arith.constant 0 : index
    %c0_14 = arith.constant 0 : index
    %13 = vector.load %arg5[%c0_13, %c0_14] : memref<1x32xf32, #tpu.memory_space<vmem>>, vector<1x32xf32>
    %14 = vector.broadcast %13 : vector<1x32xf32> to vector<16x32xf32>
    %15 = arith.addf %12, %14 : vector<16x32xf32>
    %16 = tpu.iota {dimensions = array<i32: 0>} : vector<16x256xi32>
    %c0_15 = arith.constant 0 : index
    %c0_16 = arith.constant 0 : index
    %17 = vector.load %arg6[%c0_15, %c0_16] : memref<1x256xi32, #tpu.memory_space<vmem>>, vector<1x256xi32>
    %18 = vector.broadcast %17 : vector<1x256xi32> to vector<16x256xi32>
    %19 = arith.cmpi eq, %16, %18 : vector<16x256xi32>
    %20 = arith.extui %19 : vector<16x256xi1> to vector<16x256xi32>
    %21 = arith.sitofp %20 : vector<16x256xi32> to vector<16x256xf32>
    %cst_17 = arith.constant dense<0.000000e+00> : vector<32x256xf32>
    %22 = tpu.matmul %15, %21, %cst_17 {dimension_numbers = #tpu.dot_dimension_numbers<[0], [0], [1], [1], [0, 1, 1, 1], [], []>} : vector<16x32xf32>, vector<16x256xf32>, vector<32x256xf32> -> vector<32x256xf32>
    %23 = vector.extract_strided_slice %22 {offsets = [0, 0], sizes = [32, 128], strides = [1, 1]} : vector<32x256xf32> to vector<32x128xf32>
    %24 = vector.extract_strided_slice %22 {offsets = [0, 128], sizes = [32, 128], strides = [1, 1]} : vector<32x256xf32> to vector<32x128xf32>
    %25 = arith.mulf %23, %24 : vector<32x128xf32>
    %cst_18 = arith.constant dense<0.000000e+00> : vector<128xf32>
    %26 = vector.multi_reduction <add>, %25, %cst_18 [0] : vector<32x128xf32> to vector<128xf32>
    %27 = vector.shape_cast %26 : vector<128xf32> to vector<1x128xf32>
    %28 = arith.mulf %23, %23 : vector<32x128xf32>
    %cst_19 = arith.constant dense<0.000000e+00> : vector<128xf32>
    %29 = vector.multi_reduction <add>, %28, %cst_19 [0] : vector<32x128xf32> to vector<128xf32>
    %30 = vector.shape_cast %29 : vector<128xf32> to vector<1x128xf32>
    %31 = arith.mulf %24, %24 : vector<32x128xf32>
    %cst_20 = arith.constant dense<0.000000e+00> : vector<128xf32>
    %32 = vector.multi_reduction <add>, %31, %cst_20 [0] : vector<32x128xf32> to vector<128xf32>
    %33 = vector.shape_cast %32 : vector<128xf32> to vector<1x128xf32>
    %34 = arith.mulf %30, %33 : vector<1x128xf32>
    %cst_21 = arith.constant 9.99999996E-13 : f32
    %35 = vector.broadcast %cst_21 : f32 to vector<1x128xf32>
    %36 = arith.maximumf %34, %35 : vector<1x128xf32>
    %37 = math.rsqrt %36 : vector<1x128xf32>
    %38 = arith.mulf %27, %37 : vector<1x128xf32>
    %c0_22 = arith.constant 0 : index
    %c0_23 = arith.constant 0 : index
    %39 = vector.load %arg7[%c0_22, %c0_23] : memref<1x128xf32, #tpu.memory_space<vmem>>, vector<1x128xf32>
    tpu.vector_store %arg7[%c0_22, %c0_23], %38 {strides = array<i32>} : memref<1x128xf32, #tpu.memory_space<vmem>>, vector<1x128xf32>,
    return
  }
}

</mosaic_0001>

<bundles_post_ra>
// kernel: link_finetune_forward.1
= control target key start
LH: loop header
LB: loop body
LE: loop exit
PB: predicated region body
PF: predicated region fallthrough
CT: control target
= control target key end

     0   :  { %12 = vsyncpa [#allocation3], 0  ;;  %s582_s0 = inlined_call_operand.vmem [shape: f32[16,16], index: 0, kind: input, shape index: {}]   ;;  %s583_s1 = inlined_call_operand.vmem [shape: f32[16,8], index: 1, kind: input, shape index: {}]   ;;  %s584_s2 = inlined_call_operand.hbm [shape: f32[8,32], index: 2, kind: input, shape index: {}]   ;;  %s585_s3 = inlined_call_operand.hbm [shape: f32[1,32], index: 3, kind: input, shape index: {}]   ;;  %s586_s4 = inlined_call_operand.vmem [shape: f32[32,32], index: 4, kind: input, shape index: {}]   ;;  %s587_s5 = inlined_call_operand.hbm [shape: f32[1,32], index: 5, kind: input, shape index: {}]   ;;  %s588_s6 = inlined_call_operand.vmem [shape: s32[1,256], index: 6, kind: input, shape index: {}]   ;;  %s589_s7 = inlined_call_operand.vmem [shape: f32[1,128], index: 7, kind: output, shape index: {}]  }
   0x1   :  { %13 = vsyncpa [#allocation5], 0  ;;  %s34_s26 = sshll.u32 %s585_s3, 4  ;;  %s487_s27 = smov [#allocation4]   ;;  %s35_s26 = int_to_ptr.hbm [resolvable:$true] %s34_s26 }
   0x2   :  { %s36_s28 = sshll.u32 %s487_s27, 4  ;;  %s23_s8 = sshll.u32 %s584_s2, 4  ;;  %s37_s28 = int_to_ptr.vmem [resolvable:$true] %s36_s28  ;;  %s24_s8 = int_to_ptr.hbm [resolvable:$true] %s23_s8 }
   0x3   :  { %39 = dma.hbm_to_vmem [thread:$0]  %s35_s26, 16, %s37_s28, [#allocation5]  }
   0x4   :  { %s488_s9 = smov [#allocation2]   ;;  %s47_s13 = sshll.u32 %s587_s5, 4  ;;  %s48_s13 = int_to_ptr.hbm [resolvable:$true] %s47_s13 }
   0x5   :  { %s25_s10 = sshll.u32 %s488_s9, 4  ;;  %s489_s3 = smov [#allocation6]   ;;  %s26_s10 = int_to_ptr.vmem [resolvable:$true] %s25_s10 }
   0x6   :  { %28 = dma.hbm_to_vmem [thread:$0]  %s24_s8, 128, %s26_s10, [#allocation3]  }
   0x7   :  { %s49_s14 = sshll.u32 %s489_s3, 4  ;;  %s50_s14 = int_to_ptr.vmem [resolvable:$true] %s49_s14 }
   0x8   :  { %52 = dma.hbm_to_vmem [thread:$0]  %s48_s13, 16, %s50_s14, [#allocation5]  }
   0x9   :  { %483 = dma.done.wait [#allocation3], 128  }
   0xa   :  { %484 = vsyncadd [#allocation3], 4294967168 }
   0xb   :  { %485 = dma.done.wait [#allocation5], 32  }
   0xc   :  { %486 = vsyncadd [#allocation5], 4294967264  ;;  %v70_v0 = vld [vmem:[%s583_s1 + $0x8] sm:$0xff]  ;;  %v69_v1 = vld [vmem:[%s583_s1] sm:$0xff]  ;;  %vm71_vm0 = vcmask 130048   ;;  %vm106_vm1 = vcmask 64512   ;;  %v199_v20 = vlaneseq }
   0xd   :  { %92 = vmatpush.msra.mxu2 %v70_v0  ;;  %v67_v2 = vld [vmem:[%s582_s0] sm:$0xff]  ;;  %v68_v3 = vld [vmem:[%s582_s0 + $0x8] sm:$0xff]  ;;  %v164_v7 = vld [vmem:[%s586_s4 + $0x18] sm:$0xff]  ;;  %vm169_vm2 = vcmask 261120   ;;  %v490_v26 = vmov 1.0  }
   0xe   :  { %v101_v4 = vld [vmem:[#allocation2] sm:$0xff]  ;;  %v163_v8 = vld [vmem:[%s586_s4 + $0x10] sm:$0xff]  ;;  %v162_v9 = vld [vmem:[%s586_s4 + $0x8] sm:$0xff]  ;;  %v200_v22 = vshrl.u32 %v199_v20, 7 }
   0xf   :  { %93 = vmatpush.msra.mxu2 %v69_v1  ;;  %128 = vmatpush.msra.mxu3 %v101_v4  ;;  %v407_v11 = vld [vmem:[#allocation4] ss:$0 sm:$0xff]  ;;  %v161_v17 = vld [vmem:[%s586_s4] sm:$0xff]  ;;  %v408_v27 = vld [vmem:[#allocation6] ss:$0 sm:$0xff] }
  0x10   :  { %378 = vmatmul.msk.f32.vlgmr.msra.gmra.mxu2 %vm71_vm0, %v67_v2  ;;  %v202_v21 = vld [vmem:[%s588_s6] sm:$0x3]  ;;  %v201_v25 = vadd.s32 8, %v200_v22 }
  0x11   :  { %188 = vmatpush.msrb.mxu3 %v164_v7  ;;  %v203_v23 = vperm.slane %v202_v21, 0  ;;  %v204_v24 = vperm.slane %v202_v21, 1 }
  0x13   :  { %189 = vmatpush.msrb.mxu3 %v163_v8  ;;  %vm207_vm3 = vcmp.eq.s32.totalorder %v201_v25, %v203_v23  ;;  %vm208_vm4 = vcmp.eq.s32.totalorder %v201_v25, %v204_v24  ;;  %vm205_vm5 = vcmp.eq.s32.totalorder %v200_v22, %v203_v23  ;;  %vm206_vm6 = vcmp.eq.s32.totalorder %v200_v22, %v204_v24 }
  0x14   :  { %390 = vmatpush.msk.msra.mxu1 %vm207_vm3, %v490_v26  ;;  %396 = vmatpush.msk.msra.mxu0 %vm208_vm4, %v490_v26 }
  0x15   :  { %190 = vmatpush.msrb.mxu3 %v162_v9 }
  0x16   :  { %391 = vmatpush.msk.msra.mxu1 %vm205_vm5, %v490_v26  ;;  %397 = vmatpush.msk.msra.mxu0 %vm206_vm6, %v490_v26 }
  0x17   :  { %191 = vmatpush.msrb.mxu3 %v161_v17 }
  0x18   :  { %379 = vmatmul.msk.f32.gmra.mxu2 %vm71_vm0, %v68_v3 }
  0x93   :  { %v95_v5 = vpop.f32.mrf.mxu2 }
  0x94   :  { %380 = vmatmul.msk.f32.vlgmr.msra.gmra.mxu3 %vm106_vm1, %v95_v5 }
  0x9b   :  { %v98_v6 = vpop.f32.mrf.mxu2 }
  0x9c   :  { %381 = vmatmul.msk.f32.gmra.mxu3 %vm106_vm1, %v98_v6 }
 0x117   :  { %v130_v10 = vpop.f32.mrf.mxu3 }
 0x118   :  { %v131_v13 = vadd.f32 %v407_v11, %v130_v10 }
 0x11a   :  { %v136_v16 = vmax.f32 %v131_v13, 0.0 }
 0x11f   :  { %v133_v12 = vpop.f32.mrf.mxu3 }
 0x120   :  { %v134_v14 = vadd.f32 %v407_v11, %v133_v12 }
 0x122   :  { %v137_v15 = vmax.f32 %v134_v14, 0.0 }
 0x124   :  { %152 = vmatpush.msrb.mxu2 %v137_v15 }
 0x126   :  { %153 = vmatpush.msrb.mxu2 %v136_v16 }
 0x127   :  { %382 = vmatmul.msk.f32.vlgmr.msrb.gmra.mxu2 %vm71_vm0, %v67_v2 }
 0x12f   :  { %383 = vmatmul.msk.f32.gmra.mxu2 %vm71_vm0, %v68_v3 }
 0x1aa   :  { %v155_v18 = vpop.f32.mrf.mxu2 }
 0x1ab   :  { %384 = vmatmul.msk.f32.vlgmr.msrb.gmra.mxu3 %vm169_vm2, %v155_v18 }
 0x1b2   :  { %v158_v19 = vpop.f32.mrf.mxu2 }
 0x1b3   :  { %385 = vmatmul.msk.f32.gmra.mxu3 %vm169_vm2, %v158_v19 }
 0x22e   :  { %v193_v28 = vpop.f32.mrf.mxu3 }
 0x22f   :  { %v194_v29 = vadd.f32 %v408_v27, %v193_v28 }
 0x231   :  { %217 = vxpose.xlu0.b32.start [1/2] (short) (narrow) %v194_v29, 32 }
 0x236   :  { %v196_v30 = vpop.f32.mrf.mxu3 }
 0x237   :  { %v197_v31 = vadd.f32 %v408_v27, %v196_v30 }
 0x239   :  { %218 = vxpose.xlu0.b32.end [2/2] (short) (narrow) %v197_v31, 32 }
 0x2d5   :  { %v233_v32 = vpop.trf.xlu0 }
 0x2d6   :  { %392 = vmatmul.msk.f32.vlgmr.msra.gmra.mxu1 %vm71_vm0, %v233_v32  ;;  %398 = vmatmul.msk.f32.vlgmr.msra.gmra.mxu0 %vm71_vm0, %v233_v32 }
 0x2dd   :  { %v234_v33 = vpop.trf.xlu0 }
 0x2de   :  { %393 = vmatmul.msk.f32.gmra.mxu1 %vm71_vm0, %v234_v33  ;;  %399 = vmatmul.msk.f32.gmra.mxu0 %vm71_vm0, %v234_v33 }
 0x2e5   :  { %v235_v34 = vpop.trf.xlu0 }
 0x2e6   :  { %394 = vmatmul.msk.f32.gmra.mxu1 %vm71_vm0, %v235_v34  ;;  %400 = vmatmul.msk.f32.gmra.mxu0 %vm71_vm0, %v235_v34 }
 0x2ed   :  { %v236_v35 = vpop.trf.xlu0 }
 0x2ee   :  { %395 = vmatmul.msk.f32.gmra.mxu1 %vm71_vm0, %v236_v35  ;;  %401 = vmatmul.msk.f32.gmra.mxu0 %vm71_vm0, %v236_v35 }
 0x353   :  { %v278_v36 = vpop.f32.mrf.mxu1  ;;  %v307_v37 = vpop.f32.mrf.mxu0 }
 0x354   :  { %v332_v44 = vmul.f32 %v278_v36, %v278_v36  ;;  %v345_v45 = vmul.f32 %v307_v37, %v307_v37  ;;  %v319_v61 = vmul.f32 %v307_v37, %v278_v36 }
 0x35b   :  { %v281_v38 = vpop.f32.mrf.mxu1  ;;  %v310_v39 = vpop.f32.mrf.mxu0 }
 0x35c   :  { %v333_v42 = vmul.f32 %v281_v38, %v281_v38  ;;  %v346_v43 = vmul.f32 %v310_v39, %v310_v39  ;;  %v320_v58 = vmul.f32 %v310_v39, %v281_v38 }
 0x35e   :  { %v336_v48 = vadd.f32 %v333_v42, %v332_v44  ;;  %v349_v49 = vadd.f32 %v346_v43, %v345_v45  ;;  %v323_v1 = vadd.f32 %v320_v58, %v319_v61 }
 0x363   :  { %v284_v40 = vpop.f32.mrf.mxu1  ;;  %v313_v41 = vpop.f32.mrf.mxu0 }
 0x364   :  { %v334_v46 = vmul.f32 %v284_v40, %v284_v40  ;;  %v347_v47 = vmul.f32 %v313_v41, %v313_v41  ;;  %v321_v62 = vmul.f32 %v313_v41, %v284_v40 }
 0x366   :  { %v337_v52 = vadd.f32 %v336_v48, %v334_v46  ;;  %v350_v53 = vadd.f32 %v349_v49, %v347_v47  ;;  %v324_v5 = vadd.f32 %v323_v1, %v321_v62 }
 0x36b   :  { %v287_v50 = vpop.f32.mrf.mxu1  ;;  %v316_v51 = vpop.f32.mrf.mxu0 }
 0x36c   :  { %v335_v54 = vmul.f32 %v287_v50, %v287_v50  ;;  %v348_v55 = vmul.f32 %v316_v51, %v316_v51  ;;  %v322_v3 = vmul.f32 %v316_v51, %v287_v50 }
 0x36e   :  { %v338_v56 = vadd.f32 %v337_v52, %v335_v54  ;;  %v351_v57 = vadd.f32 %v350_v53, %v348_v55  ;;  %v325_v9 = vadd.f32 %v324_v5, %v322_v3 }
 0x370   :  { %v339_v59 = vrot.slane %v338_v56, 4  ;;  %v352_v60 = vrot.slane %v351_v57, 4  ;;  %v326_v13 = vrot.slane %v325_v9, 4 }
 0x372   :  { %v340_v63 = vadd.f32 %v339_v59, %v338_v56  ;;  %v353_v0 = vadd.f32 %v352_v60, %v351_v57  ;;  %v327_v16 = vadd.f32 %v326_v13, %v325_v9 }
 0x374   :  { %v341_v2 = vrot.slane %v340_v63, 2  ;;  %v354_v4 = vrot.slane %v353_v0, 2  ;;  %v328_v17 = vrot.slane %v327_v16, 2 }
 0x376   :  { %v342_v6 = vadd.f32 %v341_v2, %v340_v63  ;;  %v355_v7 = vadd.f32 %v354_v4, %v353_v0  ;;  %v329_v20 = vadd.f32 %v328_v17, %v327_v16 }
 0x378   :  { %v343_v8 = vrot.slane %v342_v6, 1  ;;  %v356_v10 = vrot.slane %v355_v7, 1  ;;  %v330_v23 = vrot.slane %v329_v20, 1 }
 0x37a   :  { %v344_v11 = vadd.f32 %v343_v8, %v342_v6  ;;  %v357_v12 = vadd.f32 %v356_v10, %v355_v7  ;;  %v331_v26 = vadd.f32 %v330_v23, %v329_v20 }
 0x37c   :  { %v358_v14 = vmul.f32 %v357_v12, %v344_v11 }
 0x37e   :  { %v359_v15 = vmax.f32 %v358_v14, 1e-12 }
 0x380   :  { %409 = vrsqrt.f32 %v359_v15  ;;  %vm366_vm8 = vweird.f32 %v359_v15 }
 0x386   :  { %v410_v18 = vpop.eup %409 }
 0x387   :  { %v361_v19 = vmul.f32 %v410_v18, %v359_v15  ;;  %vm367_vm7 = vweird.f32 %v410_v18 }
 0x388   :  { %vm368_vm9 = vmor %vm366_vm8, %vm367_vm7 }
 0x389   :  { %v362_v21 = vmul.f32 %v410_v18, %v361_v19 }
 0x38b   :  { %v363_v22 = vmul.f32 0.5, %v362_v21 }
 0x38d   :  { %v364_v24 = vsub.f32 1.5, %v363_v22 }
 0x38f   :  { %v365_v25 = vmul.f32 %v410_v18, %v364_v24 }
 0x391   :  { %v369_v27 = vsel %vm368_vm9, %v410_v18, %v365_v25 }
 0x392   :  { %v370_v28 = vmul.f32 %v369_v27, %v331_v26 }
 0x394   :  { %371 = vst [vmem:[%s589_s7] sm:$0x1] %v370_v28 }
 0x395   :  { %376 = vsyncpa [#allocation3], 1 }
 0x396   :  { %377 = vsyncpa [#allocation5], 1 }

</bundles_post_ra>
